<compile_context>
chip_gen: v6e
topology: v6e:2x2x1
jax: 0.10.0
libtpu: 0.0.40
codegen_flags: <defaults>
</compile_context>

<pallas_src>
import jax
import jax.numpy as jnp
from jax.experimental import pallas as pl
from jax.experimental.pallas import tpu as pltpu


def _largest_divisor_leq(n, cap):
    for d in range(min(n, cap), 0, -1):
        if n % d == 0:
            return d
    return 1


def _pick_row_tile(m, cap=512):
    if m <= cap:
        return m
    for d in range(cap, 7, -1):
        if m % d == 0 and d % 8 == 0:
            return d
    return m


# ---------------------------------------------------------------------------
# Parallel-grid dense kernel: y = x @ w + b  (used for the hoisted input
# projection and the hoisted FC layer — both have no time dependence).
# ---------------------------------------------------------------------------
def dense_kernel(x_ref, w_ref, b_ref, y_ref):
    y_ref[...] = (jnp.dot(x_ref[...], w_ref[...],
                          preferred_element_type=jnp.float32)
                  + b_ref[...]).astype(y_ref.dtype)


def dense(x2d, w, b):
    """y = x2d @ w + b as a row-tiled, parallel-grid Pallas matmul."""
    m, k = x2d.shape
    n = w.shape[1]
    mt = _pick_row_tile(m)
    return pl.pallas_call(
        dense_kernel,
        out_shape=jax.ShapeDtypeStruct((m, n), jnp.float32),
        grid_spec=pltpu.PrefetchScalarGridSpec(
            num_scalar_prefetch=0,
            grid=(m // mt,),
            in_specs=[
                pl.BlockSpec((mt, k), lambda i: (i, 0)),   # row tile of x
                pl.BlockSpec((k, n), lambda i: (0, 0)),    # resident weight
                pl.BlockSpec((1, n), lambda i: (0, 0)),    # resident bias
            ],
            out_specs=pl.BlockSpec((mt, n), lambda i: (i, 0)),
        ),
        compiler_params=pltpu.CompilerParams(
            dimension_semantics=("parallel",)),
    )(x2d, w, b)


# ---------------------------------------------------------------------------
# Serial recurrence kernel: the ONLY work left in the sequential region is
# h <- tanh(P[t] + h @ W_hh), executed Tc timesteps per grid step.
# ---------------------------------------------------------------------------
def rnn_recurrent_kernel(p_ref, whh_ref, hs_ref, h_scratch):
    """One grid step == one chunk of Tc timesteps (recurrence is sequential).

    p_ref:     (Tc, B, Hp)  precomputed x@W_ih + (b_ih+b_hh) for this chunk
    whh_ref:   (Hp, Hp)     hidden->hidden weight (transposed, lane-padded)
    hs_ref:    (Tc, B, Hp)  hidden states written for this chunk (lane-dense)
    h_scratch: (B, Hp)      hidden carry, persists across grid steps
    """
    @pl.when(pl.program_id(0) == 0)
    def _():
        h_scratch[...] = jnp.zeros_like(h_scratch)

    w_hh = whh_ref[...]
    tc = p_ref.shape[0]

    def step(t, h):
        pre = p_ref[t] + jnp.dot(h, w_hh, preferred_element_type=jnp.float32)
        h_new = jnp.tanh(pre)
        hs_ref[t] = h_new.astype(hs_ref.dtype)
        return h_new

    # Tc is small and static: full unroll gives the LLO scheduler visibility.
    h_scratch[...] = jax.lax.fori_loop(0, tc, step, h_scratch[...],
                                       unroll=True)


# ---------------------------------------------------------------------------
# Wrapper: equivalent of RNN.forward(x, targets=None) -> (out, None)
# ---------------------------------------------------------------------------
def rnn_forward(x, params):
    w_ih, w_hh, b_ih, b_hh, w_fc, b_fc = params
    B, T, I = x.shape
    H = w_hh.shape[0]
    O = w_fc.shape[1]

    LANE = 128
    Hp = ((H + LANE - 1) // LANE) * LANE   # lane-dense hidden width

    # Pre-add the two RNN biases once and zero-pad the hidden dim.  Zero pads
    # are exact: padded P columns are 0 and padded W_hh columns are 0, so the
    # padded hidden columns stay tanh(0) == 0 for every timestep.
    w_ih_p = jnp.zeros((I, Hp), jnp.float32).at[:, :H].set(w_ih)
    w_hh_p = jnp.zeros((Hp, Hp), jnp.float32).at[:H, :H].set(w_hh)
    w_fc_p = jnp.zeros((Hp, O), jnp.float32).at[:H, :].set(w_fc)
    b_rnn_p = jnp.zeros((1, Hp), jnp.float32).at[:, :H].set(b_ih + b_hh)

    # (1) Hoisted input projection: one big (T*B, I) @ (I, Hp) MXU matmul,
    #     time-independent so it lives outside the serial region.
    x_tm = jnp.transpose(x, (1, 0, 2)).reshape(T * B, I)        # time-major
    p = dense(x_tm, w_ih_p, b_rnn_p).reshape(T, B, Hp)

    # (2) Serial recurrence, time-chunked: Tc timesteps per grid step.
    Tc = _largest_divisor_leq(T, 32)
    hs = pl.pallas_call(
        rnn_recurrent_kernel,
        out_shape=jax.ShapeDtypeStruct((T, B, Hp), jnp.float32),
        grid_spec=pltpu.PrefetchScalarGridSpec(
            num_scalar_prefetch=0,
            grid=(T // Tc,),
            in_specs=[
                pl.BlockSpec((Tc, B, Hp), lambda c: (c, 0, 0)),  # P chunk
                pl.BlockSpec((Hp, Hp), lambda c: (0, 0)),        # W_hh^T
            ],
            out_specs=pl.BlockSpec((Tc, B, Hp), lambda c: (c, 0, 0)),
            scratch_shapes=[pltpu.VMEM((B, Hp), jnp.float32)],   # hidden carry
        ),
        compiler_params=pltpu.CompilerParams(
            dimension_semantics=("arbitrary",)),  # recurrence => sequential
    )(p, w_hh_p)

    # (3) Hoisted FC: one batched (T*B, Hp) @ (Hp, O) matmul outside the loop.
    out_tm = dense(hs.reshape(T * B, Hp), w_fc_p, b_fc)
    out = jnp.transpose(out_tm.reshape(T, B, O), (1, 0, 2))      # batch_first

    loss = None  # targets=None path of the PyTorch module
    return out, loss


def init_params(key, input_size, n_hidden, output_size):
    """Deterministic init mirroring PyTorch default U(-1/sqrt(H), 1/sqrt(H)).

    Weights are stored pre-transposed relative to PyTorch so kernels do x @ W.
    """
    k1, k2, k3, k4, k5, k6 = jax.random.split(key, 6)
    bound = 1.0 / jnp.sqrt(jnp.float32(n_hidden))
    u = lambda k, s: jax.random.uniform(k, s, jnp.float32, -bound, bound)
    w_ih = u(k1, (input_size, n_hidden))   # == PyTorch weight_ih_l0.T
    w_hh = u(k2, (n_hidden, n_hidden))     # == PyTorch weight_hh_l0.T
    b_ih = u(k3, (1, n_hidden))
    b_hh = u(k4, (1, n_hidden))
    w_fc = u(k5, (n_hidden, output_size))  # == PyTorch fc.weight.T
    b_fc = u(k6, (1, output_size))
    return (w_ih, w_hh, b_ih, b_hh, w_fc, b_fc)


def rnn_forward_ref(x, params):
    """Pure-JAX reference (lax.scan) for correctness checking."""
    w_ih, w_hh, b_ih, b_hh, w_fc, b_fc = params
    B = x.shape[0]
    H = w_hh.shape[0]

    def step(h, xt):
        h_new = jnp.tanh(xt @ w_ih + h @ w_hh + b_ih + b_hh)
        return h_new, h_new

    x_tm = jnp.transpose(x, (1, 0, 2))
    _, hs = jax.lax.scan(step, jnp.zeros((B, H), jnp.float32), x_tm)
    out = jnp.transpose(hs, (1, 0, 2)) @ w_fc + b_fc
    return out


if __name__ == "__main__":
    # RNNConfig: n_hidden=2, n_layer=1; input/output sizes chosen small.
    INPUT_SIZE, N_HIDDEN, OUTPUT_SIZE = 16, 2, 8
    BATCH, SEQ = 2, 8

    key = jax.random.PRNGKey(0)
    k_x, k_p = jax.random.split(key)
    x = jax.random.normal(k_x, (BATCH, SEQ, INPUT_SIZE), jnp.float32)
    params = init_params(k_p, INPUT_SIZE, N_HIDDEN, OUTPUT_SIZE)

    out, loss = rnn_forward(x, params)
    out = jax.block_until_ready(out)

    ref = jax.block_until_ready(rnn_forward_ref(x, params))
    assert out.shape == (BATCH, SEQ, OUTPUT_SIZE)
    assert loss is None
    assert jnp.allclose(out, ref, rtol=1e-5, atol=1e-5)

    print("KERNEL_OK")
</pallas_src>

<mosaic_0001>
module attributes {stable_mosaic.version = 11 : i64} {
  func.func @dense_kernel(%arg0: i32, %arg1: memref<16x16xf32, #tpu.memory_space<vmem>>, %arg2: memref<16x128xf32, #tpu.memory_space<vmem>>, %arg3: memref<1x128xf32, #tpu.memory_space<vmem>>, %arg4: memref<16x128xf32, #tpu.memory_space<vmem>>) attributes {dimension_semantics = [#tpu.dimension_semantics<parallel>], iteration_bounds = array<i64: 1>, scalar_prefetch = 0 : i64, scratch_operands = 0 : i64, tpu.core_type = #tpu.core_type<tc>, window_params = [{transform_indices = @transform_0, window_bounds = array<i64: 16, 16>}, {pipeline_mode = #tpu.pipeline_mode<synchronous>, transform_indices = @transform_1, window_bounds = array<i64: 16, 128>}, {pipeline_mode = #tpu.pipeline_mode<synchronous>, transform_indices = @transform_2, window_bounds = array<i64: 1, 128>}, {transform_indices = @transform_3, window_bounds = array<i64: 16, 128>}]} {
    %c0 = arith.constant 0 : index
    %c0_0 = arith.constant 0 : index
    %0 = vector.load %arg1[%c0, %c0_0] : memref<16x16xf32, #tpu.memory_space<vmem>>, vector<16x16xf32>
    %c0_1 = arith.constant 0 : index
    %c0_2 = arith.constant 0 : index
    %1 = vector.load %arg2[%c0_1, %c0_2] : memref<16x128xf32, #tpu.memory_space<vmem>>, vector<16x128xf32>
    %cst = arith.constant dense<0.000000e+00> : vector<16x128xf32>
    %2 = tpu.matmul %0, %1, %cst {dimension_numbers = #tpu.dot_dimension_numbers<[1], [0], [0], [1], [0, 0, 1, 1], [], []>} : vector<16x16xf32>, vector<16x128xf32>, vector<16x128xf32> -> vector<16x128xf32>
    %c0_3 = arith.constant 0 : index
    %c0_4 = arith.constant 0 : index
    %3 = vector.load %arg3[%c0_3, %c0_4] : memref<1x128xf32, #tpu.memory_space<vmem>>, vector<1x128xf32>
    %4 = vector.broadcast %3 : vector<1x128xf32> to vector<16x128xf32>
    %5 = arith.addf %2, %4 : vector<16x128xf32>
    %c0_5 = arith.constant 0 : index
    %c0_6 = arith.constant 0 : index
    %6 = vector.load %arg4[%c0_5, %c0_6] : memref<16x128xf32, #tpu.memory_space<vmem>>, vector<16x128xf32>
    tpu.vector_store %arg4[%c0_5, %c0_6], %5 {strides = array<i32>} : memref<16x128xf32, #tpu.memory_space<vmem>>, vector<16x128xf32>,
    return
  }
  func.func @transform_0(%arg0: i32) -> (i32, i32) {
    %c0_i32 = arith.constant 0 : i32
    %c0_i32_0 = arith.constant 0 : i32
    return %arg0, %c0_i32 : i32, i32
  }
  func.func @transform_1(%arg0: i32) -> (i32, i32) {
    %c0_i32 = arith.constant 0 : i32
    %c0_i32_0 = arith.constant 0 : i32
    %c0_i32_1 = arith.constant 0 : i32
    return %c0_i32, %c0_i32_0 : i32, i32
  }
  func.func @transform_2(%arg0: i32) -> (i32, i32) {
    %c0_i32 = arith.constant 0 : i32
    %c0_i32_0 = arith.constant 0 : i32
    %c0_i32_1 = arith.constant 0 : i32
    return %c0_i32, %c0_i32_0 : i32, i32
  }
  func.func @transform_3(%arg0: i32) -> (i32, i32) {
    %c0_i32 = arith.constant 0 : i32
    %c0_i32_0 = arith.constant 0 : i32
    return %arg0, %c0_i32 : i32, i32
  }
}

</mosaic_0001>

<bundles_post_ra>
// kernel: tpu_custom_call.1
= control target key start
LH: loop header
LB: loop body
LE: loop exit
PB: predicated region body
PF: predicated region fallthrough
CT: control target
= control target key end

     0   :  { %8 = vsyncpa [#allocation3], 0  ;;  %s287_s0 = inlined_call_operand.hbm [shape: f32[16,16], index: 0, kind: input, shape index: {}]   ;;  %s288_s1 = inlined_call_operand.hbm [shape: f32[16,128], index: 1, kind: input, shape index: {}]   ;;  %s289_s2 = inlined_call_operand.vmem [shape: f32[1,128], index: 2, kind: input, shape index: {}]   ;;  %s290_s3 = inlined_call_operand.hbm [shape: f32[16,128], index: 3, kind: output, shape index: {}]  }
   0x1   :  { %9 = vsyncpa [#allocation6], 0 }
   0x2   :  { %10 = vsyncpa [#allocation4], 0  ;;  %s241_s12 = smov [#allocation2]  }
   0x3   :  { %s16_s13 = sshll.u32 %s241_s12, 4  ;;  %s17_s13 = int_to_ptr.vmem [resolvable:$true] %s16_s13 }
   0x4   :  { %s183_s14 = scalar_lea.vmem %s17_s13, 256  ;;  %p188_p1 = scmp.lt.s32.totalorder %s17_s13, %s17_s13 }
   0x5   :  { %p184_p0 = scmp.ne.s32.totalorder %s17_s13, %s183_s14  ;;  %p189_p2 = scmp.lt.s32.totalorder %s183_s14, %s183_s14 }
   0x7   :  { %p190_p3 = por %p189_p2, %p188_p1 }
   0x9   :  { %p191_p4 = pnand %p190_p3, %p184_p0 }
   0xb   :  { %194 = shalt.err (!%p191_p4)
}
   0xc   :  { %s242_s15 = smov 128   ;;  %s243_s16 = smov 8  }
   0xd   :  { %22 = dma.hbm_to_vmem [thread:$0]  %s287_s0, 256, %s17_s13, [#allocation3], %s242_s15, %s242_s15, %s243_s16  }
   0xe   :  { %s244_s19 = smov [#allocation5]  }
   0xf   :  { %s28_s20 = sshll.u32 %s244_s19, 4  ;;  %s29_s20 = int_to_ptr.vmem [resolvable:$true] %s28_s20 }
  0x10   :  { %s203_s21 = scalar_lea.vmem %s29_s20, 256  ;;  %p208_p6 = scmp.lt.s32.totalorder %s29_s20, %s29_s20 }
  0x11   :  { %p204_p5 = scmp.ne.s32.totalorder %s29_s20, %s203_s21  ;;  %p209_p7 = scmp.lt.s32.totalorder %s203_s21, %s203_s21 }
  0x13   :  { %p210_p8 = por %p209_p7, %p208_p6 }
  0x15   :  { %p211_p9 = pnand %p210_p8, %p204_p5 }
  0x17   :  { %214 = shalt.err (!%p211_p9)
}
  0x18   :  { %34 = dma.hbm_to_vmem [thread:$0]  %s288_s1, 256, %s29_s20, [#allocation6], %s242_s15, %s242_s15, %s243_s16  }
  0x19   :  { %235 = dma.done.wait [#allocation3], 256  }
  0x1a   :  { %236 = vsyncadd [#allocation3], 4294967040 }
  0x1b   :  { %237 = dma.done.wait [#allocation6], 256  }
  0x1c   :  { %238 = vsyncadd [#allocation6], 4294967040  ;;  %vm54_vm0 = vcmask 130048   ;;  %v46_v0 = vld [vmem:[#allocation5 + $0x8] sm:$0xff]  ;;  %v45_v1 = vld [vmem:[#allocation5] sm:$0xff]  ;;  %s245_s1 = smov [#allocation7]  }
  0x1d   :  { %v43_v2 = vld [vmem:[#allocation2] sm:$0xff]  ;;  %163 = vmatprep.subr.mxu0 %v46_v0  ;;  %v44_v3 = vld [vmem:[#allocation2 + $0x8] sm:$0xff]  ;;  %s143_s25 = sshll.u32 %s245_s1, 4  ;;  %s144_s25 = int_to_ptr.vmem [resolvable:$true] %s143_s25 }
  0x1e   :  { %167 = vmatprep.mubr.msk.f32.mxu0 %vm54_vm0, %v43_v2  ;;  %164 = vmatpush3.msra.mxu0 %v46_v0  ;;  %v156_v4 = vld [vmem:[%s289_s2] ss:$0 sm:$0xff]  ;;  %s215_s26 = scalar_lea.vmem %s144_s25, 256  ;;  %p220_p11 = scmp.lt.s32.totalorder %s144_s25, %s144_s25 }
  0x1f   :  { %165 = vmatprep.subr.mxu0 %v45_v1  ;;  %p216_p10 = scmp.ne.s32.totalorder %s144_s25, %s215_s26  ;;  %p221_p12 = scmp.lt.s32.totalorder %s215_s26, %s215_s26 }
  0x20   :  { %166 = vmatpush3.msra.mxu0 %v45_v1 }
  0x21   :  { %168 = vmatmul.mubr.msk.f32.vlgmr.msra.gmra.mxu0 %vm54_vm0, %v44_v3  ;;  %p222_p13 = por %p221_p12, %p220_p11 }
  0x23   :  { %p223_p0 = pnand %p222_p13, %p216_p10 }
  0xe1   :  { %v169_v5 = vpop.f32.mrf.mxu0 }
  0xe2   :  { %v133_v6 = vadd.f32 %v169_v5, %v156_v4 }
  0xe3   :  { %v127_v7 = vpop.f32.mrf.mxu0 }
  0xe4   :  { %137 = vst [vmem:[#allocation7 + $0x8] sm:$0xff] %v133_v6  ;;  %v128_v8 = vadd.f32 %v156_v4, %v127_v7 }
  0xe6   :  { %136 = vst [vmem:[#allocation7] sm:$0xff] %v128_v8 }
  0xe7   :  { %226 = shalt.err (!%p223_p0)
}
  0xe8   :  { %149 = dma.vmem_to_hbm [thread:$0]  %s144_s25, 256, %s290_s3, [#allocation4], %s242_s15, %s242_s15, %s243_s16  }
  0xe9   :  { %239 = dma.done.wait [#allocation4], 256  }
  0xea   :  { %240 = vsyncadd [#allocation4], 4294967040 }
  0xeb   :  { %153 = vsyncpa [#allocation3], 1 }
  0xec   :  { %154 = vsyncpa [#allocation6], 1 }
  0xed   :  { %155 = vsyncpa [#allocation4], 1 }

</bundles_post_ra>
